<compile_context>
chip_gen: v6e
topology: v6e:2x2x1
jax: 0.10.0
libtpu: 0.0.40
codegen_flags: <defaults>
</compile_context>

<pallas_src>
import functools

import jax
import jax.numpy as jnp
from jax.experimental import pallas as pl
from jax.experimental.pallas import tpu as pltpu


def _round_up(n, m):
    return ((n + m - 1) // m) * m


def thresh_mlp_kernel(x_ref, w1_ref, b1_ref, w2t_ref, b2t_ref, w3t_ref, b3t_ref, o_ref):
    # ----- Layer 1 (batch-major): (tb, in) @ (in, h1) -> (tb, h1). -----------
    # Cast x to bf16 in-kernel (a couple of VPU ops per block) instead of a
    # wrapper-side HBM pass; accumulate in f32 on the MXU.
    x = x_ref[...].astype(jnp.bfloat16)
    h = jnp.dot(x, w1_ref[...], preferred_element_type=jnp.float32)
    h = jnp.maximum(h + b1_ref[...], 0.0)                      # f32 (tb, h1)

    # ----- Switch to feature-major so everything downstream is lane-dense. ---
    # h1 == 128 and tb is a multiple of 256, so this is a fully (8,128)-aligned
    # XLU transpose (the XLU slot is otherwise idle in this kernel).
    ht = jnp.transpose(h).astype(jnp.bfloat16)                 # (h1, tb) bf16

    # ----- Layer 2 (feature-major): (h2, h1) @ (h1, tb) -> (h2, tb). ---------
    h2 = jnp.dot(w2t_ref[...], ht, preferred_element_type=jnp.float32)
    h2 = jnp.maximum(h2 + b2t_ref[...], 0.0)                   # f32 (h2, tb)

    # ----- Layer 3 logits (feature-major): (out, h2) @ (h2, tb) -> (out, tb).
    logits = jnp.dot(w3t_ref[...], h2.astype(jnp.bfloat16),
                     preferred_element_type=jnp.float32)
    logits = logits + b3t_ref[...]                             # f32 (out, tb)

    # ----- Softmax over the feature axis (sublane axis, out_dim rows). -------
    # out_dim is tiny (default 4): unroll max/sum over static sublane slices so
    # it stays on the VPU with full-lane (1, tb) vregs; exp + approx reciprocal
    # land on the otherwise-idle EUP slot.  Store is lane-dense (out, tb).
    n_out = logits.shape[0]
    rows = [logits[k:k + 1, :] for k in range(n_out)]
    m = functools.reduce(jnp.maximum, rows)
    e = jnp.exp(logits - m)
    erows = [e[k:k + 1, :] for k in range(n_out)]
    denom = functools.reduce(lambda a, b: a + b, erows)
    o_ref[...] = (e * pl.reciprocal(denom, approx=True)).astype(o_ref.dtype)


def thresh_model_forward(x, params, *, block_batch=4096):
    """x: (B, in_dim) float32; params: (W1,b1,W2,b2,W3,b3), W as (in,out), b as (1,out)."""
    w1, b1, w2, b2, w3, b3 = params
    B, in_dim = x.shape
    h1, h2, out_dim = w1.shape[1], w2.shape[1], w3.shape[1]

    # Batch tile: multiple of 256 (MXU/lane aligned on every generation; keeps
    # the in-kernel transpose fully tile-aligned).  When the batch fits in at
    # most two tiles, split it in two so the "parallel" batch axis gives v7x's
    # two TensorCores a tile each.
    if B <= 2 * block_batch:
        tb = max(256, _round_up(pl.cdiv(B, 2), 256))
    else:
        tb = block_batch
    n_blocks = pl.cdiv(B, tb)
    Bp = n_blocks * tb

    # Only batches smaller than one tile get padded (negligible); large ragged
    # batches use a partial last input block instead of a full jnp.pad HBM pass.
    if B < tb:
        x = jnp.pad(x, ((0, tb - B), (0, 0)))

    # One-time tiny weight preprocessing: bf16 MXU operands; layers 2/3 kept
    # feature-major (pre-transposed).  Biases stay f32 (v5e has no bf16 VPU).
    w1q = w1.astype(jnp.bfloat16)                  # (in,  h1)
    w2t = w2.T.astype(jnp.bfloat16)                # (h2,  h1)
    w3t = w3.T.astype(jnp.bfloat16)                # (out, h2)
    b2t = b2.reshape(h2, 1)                        # (h2,  1)
    b3t = b3.reshape(out_dim, 1)                   # (out, 1)

    def resident(arr):
        # Whole-array block, same block every grid step -> stays VMEM-resident.
        return pl.BlockSpec(arr.shape, lambda i: (0, 0))

    grid_spec = pltpu.PrefetchScalarGridSpec(
        num_scalar_prefetch=0,
        grid=(n_blocks,),
        in_specs=[
            pl.BlockSpec((tb, in_dim), lambda i: (i, 0)),   # x: batch-tiled, pipelined
            resident(w1q), resident(b1),
            resident(w2t), resident(b2t),
            resident(w3t), resident(b3t),
        ],
        # Lane-dense output: last dim is the batch tile (multiple of 128).
        out_specs=pl.BlockSpec((out_dim, tb), lambda i: (0, i)),
    )

    flops = 2 * Bp * (in_dim * h1 + h1 * h2 + h2 * out_dim)
    bytes_accessed = (
        x.size * x.dtype.itemsize
        + Bp * out_dim * 4
        + sum(a.size * a.dtype.itemsize for a in (w1q, b1, w2t, b2t, w3t, b3t))
    )

    out_t = pl.pallas_call(
        thresh_mlp_kernel,
        # TODO(synk): could emit bf16 output if downstream accepts it (halves writeback).
        out_shape=jax.ShapeDtypeStruct((out_dim, Bp), jnp.float32),
        grid_spec=grid_spec,
        compiler_params=pltpu.CompilerParams(
            dimension_semantics=("parallel",),     # v7x: batch tiles split across both TCs
            vmem_limit_bytes=32 * 1024 * 1024,     # ~tb*1.2 KB footprint << budget even at tb=8192
        ),
        cost_estimate=pl.CostEstimate(
            flops=flops,
            transcendentals=Bp * (out_dim + 1),    # exp per logit + reciprocal per row
            bytes_accessed=bytes_accessed,
        ),
    )(x, w1q, b1, w2t, b2t, w3t, b3t)

    # Un-transpose (tiny (out_dim, B) slab) and drop padded/garbage columns.
    return out_t[:, :B].T


def init_params(key, num_models=4, num_threshs=4, hidden_sizes=(128, 64)):
    """Deterministic init mimicking nn.Linear's uniform(-1/sqrt(fan_in), 1/sqrt(fan_in))."""
    layer_sizes = [2 * num_models + 2 * num_threshs] + list(hidden_sizes) + [num_threshs]
    params = []
    for i in range(len(layer_sizes) - 1):
        fan_in, fan_out = layer_sizes[i], layer_sizes[i + 1]
        key, kw, kb = jax.random.split(key, 3)
        bound = 1.0 / jnp.sqrt(float(fan_in))
        # Stored as (in, out) so the model computes x @ W (== PyTorch x @ W.T).
        w = jax.random.uniform(kw, (fan_in, fan_out), jnp.float32, -bound, bound)
        b = jax.random.uniform(kb, (1, fan_out), jnp.float32, -bound, bound)
        params.extend([w, b])
    return tuple(params)


def reference_forward(x, params):
    w1, b1, w2, b2, w3, b3 = params
    h = jnp.maximum(x @ w1 + b1, 0.0)
    h = jnp.maximum(h @ w2 + b2, 0.0)
    logits = h @ w3 + b3
    return jax.nn.softmax(logits, axis=1)


if __name__ == "__main__":
    key = jax.random.PRNGKey(0)
    num_models, num_threshs = 4, 4
    in_dim = 2 * num_models + 2 * num_threshs  # 16

    kx1, kx2, kp = jax.random.split(key, 3)
    params = init_params(kp, num_models=num_models, num_threshs=num_threshs)

    # Small batch: single (padded-to-one-tile) grid step.
    batch = 8
    x = jax.random.normal(kx1, (batch, in_dim), jnp.float32)
    out = jax.block_until_ready(thresh_model_forward(x, params))
    ref = reference_forward(x, params)
    assert out.shape == (batch, num_threshs)
    assert jnp.allclose(out, ref, atol=2e-2, rtol=2e-2), "mismatch vs. pure-JAX reference (small batch)"
    assert jnp.allclose(jnp.sum(out, axis=1), 1.0, atol=1e-2), "softmax rows must sum to 1"

    # Non-multiple batch exercising a multi-step grid with a partial last input
    # block (300 rows -> two 256-row tiles, no full-batch padding pass).
    batch2 = 300
    x2 = jax.random.normal(kx2, (batch2, in_dim), jnp.float32)
    out2 = jax.block_until_ready(thresh_model_forward(x2, params))
    ref2 = reference_forward(x2, params)
    assert out2.shape == (batch2, num_threshs)
    assert jnp.allclose(out2, ref2, atol=2e-2, rtol=2e-2), "mismatch vs. pure-JAX reference (tiled batch)"
    assert jnp.allclose(jnp.sum(out2, axis=1), 1.0, atol=1e-2), "softmax rows must sum to 1 (tiled batch)"

    print("KERNEL_OK")
</pallas_src>

<mosaic_0001>
module attributes {stable_mosaic.version = 11 : i64} {
  func.func @thresh_mlp_kernel(%arg0: i32, %arg1: memref<256x16xf32, #tpu.memory_space<vmem>>, %arg2: memref<16x128xbf16, #tpu.memory_space<vmem>>, %arg3: memref<1x128xf32, #tpu.memory_space<vmem>>, %arg4: memref<64x128xbf16, #tpu.memory_space<vmem>>, %arg5: memref<64x1xf32, #tpu.memory_space<vmem>>, %arg6: memref<4x64xbf16, #tpu.memory_space<vmem>>, %arg7: memref<4x1xf32, #tpu.memory_space<vmem>>, %arg8: memref<4x256xf32, #tpu.memory_space<vmem>>) attributes {dimension_semantics = [#tpu.dimension_semantics<parallel>], iteration_bounds = array<i64: 1>, scalar_prefetch = 0 : i64, scratch_operands = 0 : i64, tpu.core_type = #tpu.core_type<tc>, window_params = [{transform_indices = @transform_0, window_bounds = array<i64: 256, 16>}, {pipeline_mode = #tpu.pipeline_mode<synchronous>, transform_indices = @transform_1, window_bounds = array<i64: 16, 128>}, {pipeline_mode = #tpu.pipeline_mode<synchronous>, transform_indices = @transform_2, window_bounds = array<i64: 1, 128>}, {pipeline_mode = #tpu.pipeline_mode<synchronous>, transform_indices = @transform_3, window_bounds = array<i64: 64, 128>}, {pipeline_mode = #tpu.pipeline_mode<synchronous>, transform_indices = @transform_4, window_bounds = array<i64: 64, 1>}, {pipeline_mode = #tpu.pipeline_mode<synchronous>, transform_indices = @transform_5, window_bounds = array<i64: 4, 64>}, {pipeline_mode = #tpu.pipeline_mode<synchronous>, transform_indices = @transform_6, window_bounds = array<i64: 4, 1>}, {transform_indices = @transform_7, window_bounds = array<i64: 4, 256>}]} {
    %c0 = arith.constant 0 : index
    %c0_0 = arith.constant 0 : index
    %0 = vector.load %arg1[%c0, %c0_0] : memref<256x16xf32, #tpu.memory_space<vmem>>, vector<256x16xf32>
    %1 = arith.truncf %0 : vector<256x16xf32> to vector<256x16xbf16>
    %c0_1 = arith.constant 0 : index
    %c0_2 = arith.constant 0 : index
    %2 = vector.load %arg2[%c0_1, %c0_2] : memref<16x128xbf16, #tpu.memory_space<vmem>>, vector<16x128xbf16>
    %cst = arith.constant dense<0.000000e+00> : vector<256x128xf32>
    %3 = tpu.matmul %1, %2, %cst {dimension_numbers = #tpu.dot_dimension_numbers<[1], [0], [0], [1], [0, 0, 1, 1], [], []>} : vector<256x16xbf16>, vector<16x128xbf16>, vector<256x128xf32> -> vector<256x128xf32>
    %c0_3 = arith.constant 0 : index
    %c0_4 = arith.constant 0 : index
    %4 = vector.load %arg3[%c0_3, %c0_4] : memref<1x128xf32, #tpu.memory_space<vmem>>, vector<1x128xf32>
    %5 = vector.broadcast %4 : vector<1x128xf32> to vector<256x128xf32>
    %6 = arith.addf %3, %5 : vector<256x128xf32>
    %cst_5 = arith.constant 0.000000e+00 : f32
    %7 = vector.broadcast %cst_5 : f32 to vector<256x128xf32>
    %8 = arith.maximumf %6, %7 : vector<256x128xf32>
    %9 = tpu.transpose %8, [1, 0] : vector<256x128xf32> -> vector<128x256xf32>
    %10 = arith.truncf %9 : vector<128x256xf32> to vector<128x256xbf16>
    %c0_6 = arith.constant 0 : index
    %c0_7 = arith.constant 0 : index
    %11 = vector.load %arg4[%c0_6, %c0_7] : memref<64x128xbf16, #tpu.memory_space<vmem>>, vector<64x128xbf16>
    %cst_8 = arith.constant dense<0.000000e+00> : vector<64x256xf32>
    %12 = tpu.matmul %11, %10, %cst_8 {dimension_numbers = #tpu.dot_dimension_numbers<[1], [0], [0], [1], [0, 0, 1, 1], [], []>} : vector<64x128xbf16>, vector<128x256xbf16>, vector<64x256xf32> -> vector<64x256xf32>
    %c0_9 = arith.constant 0 : index
    %c0_10 = arith.constant 0 : index
    %13 = vector.load %arg5[%c0_9, %c0_10] : memref<64x1xf32, #tpu.memory_space<vmem>>, vector<64x1xf32>
    %14 = vector.broadcast %13 : vector<64x1xf32> to vector<64x256xf32>
    %15 = arith.addf %12, %14 : vector<64x256xf32>
    %cst_11 = arith.constant 0.000000e+00 : f32
    %16 = vector.broadcast %cst_11 : f32 to vector<64x256xf32>
    %17 = arith.maximumf %15, %16 : vector<64x256xf32>
    %c0_12 = arith.constant 0 : index
    %c0_13 = arith.constant 0 : index
    %18 = vector.load %arg6[%c0_12, %c0_13] : memref<4x64xbf16, #tpu.memory_space<vmem>>, vector<4x64xbf16>
    %19 = arith.truncf %17 : vector<64x256xf32> to vector<64x256xbf16>
    %cst_14 = arith.constant dense<0.000000e+00> : vector<4x256xf32>
    %20 = tpu.matmul %18, %19, %cst_14 {dimension_numbers = #tpu.dot_dimension_numbers<[1], [0], [0], [1], [0, 0, 1, 1], [], []>} : vector<4x64xbf16>, vector<64x256xbf16>, vector<4x256xf32> -> vector<4x256xf32>
    %c0_15 = arith.constant 0 : index
    %c0_16 = arith.constant 0 : index
    %21 = vector.load %arg7[%c0_15, %c0_16] : memref<4x1xf32, #tpu.memory_space<vmem>>, vector<4x1xf32>
    %22 = vector.broadcast %21 : vector<4x1xf32> to vector<4x256xf32>
    %23 = arith.addf %20, %22 : vector<4x256xf32>
    %24 = vector.extract_strided_slice %23 {offsets = [0, 0], sizes = [1, 256], strides = [1, 1]} : vector<4x256xf32> to vector<1x256xf32>
    %25 = vector.extract_strided_slice %23 {offsets = [1, 0], sizes = [1, 256], strides = [1, 1]} : vector<4x256xf32> to vector<1x256xf32>
    %26 = vector.extract_strided_slice %23 {offsets = [2, 0], sizes = [1, 256], strides = [1, 1]} : vector<4x256xf32> to vector<1x256xf32>
    %27 = vector.extract_strided_slice %23 {offsets = [3, 0], sizes = [1, 256], strides = [1, 1]} : vector<4x256xf32> to vector<1x256xf32>
    %28 = arith.maximumf %24, %25 : vector<1x256xf32>
    %29 = arith.maximumf %28, %26 : vector<1x256xf32>
    %30 = arith.maximumf %29, %27 : vector<1x256xf32>
    %31 = vector.broadcast %30 : vector<1x256xf32> to vector<4x256xf32>
    %32 = arith.subf %23, %31 : vector<4x256xf32>
    %33 = math.exp %32 : vector<4x256xf32>
    %34 = vector.extract_strided_slice %33 {offsets = [0, 0], sizes = [1, 256], strides = [1, 1]} : vector<4x256xf32> to vector<1x256xf32>
    %35 = vector.extract_strided_slice %33 {offsets = [1, 0], sizes = [1, 256], strides = [1, 1]} : vector<4x256xf32> to vector<1x256xf32>
    %36 = vector.extract_strided_slice %33 {offsets = [2, 0], sizes = [1, 256], strides = [1, 1]} : vector<4x256xf32> to vector<1x256xf32>
    %37 = vector.extract_strided_slice %33 {offsets = [3, 0], sizes = [1, 256], strides = [1, 1]} : vector<4x256xf32> to vector<1x256xf32>
    %38 = arith.addf %34, %35 : vector<1x256xf32>
    %39 = arith.addf %38, %36 : vector<1x256xf32>
    %40 = arith.addf %39, %37 : vector<1x256xf32>
    %41 = tpu.reciprocal %40 {approx = true} : vector<1x256xf32> -> vector<1x256xf32>
    %42 = vector.broadcast %41 : vector<1x256xf32> to vector<4x256xf32>
    %43 = arith.mulf %33, %42 : vector<4x256xf32>
    %c0_17 = arith.constant 0 : index
    %c0_18 = arith.constant 0 : index
    %44 = vector.load %arg8[%c0_17, %c0_18] : memref<4x256xf32, #tpu.memory_space<vmem>>, vector<4x256xf32>
    tpu.vector_store %arg8[%c0_17, %c0_18], %43 {strides = array<i32>} : memref<4x256xf32, #tpu.memory_space<vmem>>, vector<4x256xf32>,
    return
  }
  func.func @transform_0(%arg0: i32) -> (i32, i32) {
    %c0_i32 = arith.constant 0 : i32
    %c0_i32_0 = arith.constant 0 : i32
    return %arg0, %c0_i32 : i32, i32
  }
  func.func @transform_1(%arg0: i32) -> (i32, i32) {
    %c0_i32 = arith.constant 0 : i32
    %c0_i32_0 = arith.constant 0 : i32
    %c0_i32_1 = arith.constant 0 : i32
    return %c0_i32, %c0_i32_0 : i32, i32
  }
  func.func @transform_2(%arg0: i32) -> (i32, i32) {
    %c0_i32 = arith.constant 0 : i32
    %c0_i32_0 = arith.constant 0 : i32
    %c0_i32_1 = arith.constant 0 : i32
    return %c0_i32, %c0_i32_0 : i32, i32
  }
  func.func @transform_3(%arg0: i32) -> (i32, i32) {
    %c0_i32 = arith.constant 0 : i32
    %c0_i32_0 = arith.constant 0 : i32
    %c0_i32_1 = arith.constant 0 : i32
    return %c0_i32, %c0_i32_0 : i32, i32
  }
  func.func @transform_4(%arg0: i32) -> (i32, i32) {
    %c0_i32 = arith.constant 0 : i32
    %c0_i32_0 = arith.constant 0 : i32
    %c0_i32_1 = arith.constant 0 : i32
    return %c0_i32, %c0_i32_0 : i32, i32
  }
  func.func @transform_5(%arg0: i32) -> (i32, i32) {
    %c0_i32 = arith.constant 0 : i32
    %c0_i32_0 = arith.constant 0 : i32
    %c0_i32_1 = arith.constant 0 : i32
    return %c0_i32, %c0_i32_0 : i32, i32
  }
  func.func @transform_6(%arg0: i32) -> (i32, i32) {
    %c0_i32 = arith.constant 0 : i32
    %c0_i32_0 = arith.constant 0 : i32
    %c0_i32_1 = arith.constant 0 : i32
    return %c0_i32, %c0_i32_0 : i32, i32
  }
  func.func @transform_7(%arg0: i32) -> (i32, i32) {
    %c0_i32 = arith.constant 0 : i32
    %c0_i32_0 = arith.constant 0 : i32
    return %c0_i32, %arg0 : i32, i32
  }
}

</mosaic_0001>

<bundles_post_ra>
// kernel: tpu_custom_call.1
= control target key start
LH: loop header
LB: loop body
LE: loop exit
PB: predicated region body
PF: predicated region fallthrough
CT: control target
= control target key end

     0   :  { %vm91_vm0 = vcmask 130048   ;;  %s1238_s0 = inlined_call_operand.vmem [shape: f32[256,16], index: 0, kind: input, shape index: {}]   ;;  %s1239_s1 = inlined_call_operand.vmem [shape: bf16[16,128], index: 1, kind: input, shape index: {}]   ;;  %s1240_s2 = inlined_call_operand.vmem [shape: f32[1,128], index: 2, kind: input, shape index: {}]   ;;  %s1241_s3 = inlined_call_operand.vmem [shape: bf16[64,128], index: 3, kind: input, shape index: {}]   ;;  %s1242_s4 = inlined_call_operand.vmem [shape: f32[64,1], index: 4, kind: input, shape index: {}]   ;;  %s1243_s5 = inlined_call_operand.vmem [shape: bf16[4,64], index: 5, kind: input, shape index: {}]   ;;  %s1244_s6 = inlined_call_operand.vmem [shape: f32[4,1], index: 6, kind: input, shape index: {}]   ;;  %s1245_s7 = inlined_call_operand.hbm [shape: f32[4,256], index: 7, kind: output, shape index: {}]  }
   0x1   :  { %v917_v0 = vld [vmem:[%s1239_s1] sm:$0xff]   ;;  %v29_v2 = vld [vmem:[%s1238_s0 + $0x8] sm:$0xff]  ;;  %v30_v3 = vld [vmem:[%s1238_s0 + $0x10] sm:$0xff] }
   0x2   :  { %v28_v1 = vld [vmem:[%s1238_s0] sm:$0xff]  ;;  %767 = vmatprep.subr.bf16.mxu0 %v917_v0  ;;  %v31_v5 = vld [vmem:[%s1238_s0 + $0x18] sm:$0xff]  ;;  %v33_v7 = vld [vmem:[%s1238_s0 + $0x28] sm:$0xff] }
   0x3   :  { %v60_v4 = vpack.c.bf16 %v29_v2, %v28_v1  ;;  %v32_v6 = vld [vmem:[%s1238_s0 + $0x20] sm:$0xff]  ;;  %768 = vmatpush3.bf16.msra.mxu0 %v917_v0  ;;  %v61_v8 = vpack.c.bf16 %v31_v5, %v30_v3  ;;  %v34_v10 = vld [vmem:[%s1238_s0 + $0x30] sm:$0xff]  ;;  %v35_v11 = vld [vmem:[%s1238_s0 + $0x38] sm:$0xff] }
   0x4   :  { %v62_v9 = vpack.c.bf16 %v33_v7, %v32_v6  ;;  %v36_v12 = vld [vmem:[%s1238_s0 + $0x40] sm:$0xff]  ;;  %v37_v13 = vld [vmem:[%s1238_s0 + $0x48] sm:$0xff]  ;;  %v63_v14 = vpack.c.bf16 %v35_v11, %v34_v10 }
   0x5   :  { %769 = vmatprep.mubr.msk.bf16.mxu0 %vm91_vm0, %v60_v4  ;;  %v64_v15 = vpack.c.bf16 %v37_v13, %v36_v12 }
   0x6   :  { %770 = vmatmul.mubr.msk.bf16.vlgmr.msra.gmra.mxu0 %vm91_vm0, %v61_v8 }
   0x7   :  { %773 = vmatprep.mubr.msk.bf16.mxu0 %vm91_vm0, %v62_v9 }
   0xe   :  { %774 = vmatmul.mubr.msk.bf16.gmra.mxu0 %vm91_vm0, %v63_v14 }
   0xf   :  { %12 = vsyncpa [#allocation3], 0  ;;  %777 = vmatprep.mubr.msk.bf16.mxu0 %vm91_vm0, %v64_v15  ;;  %v38_v16 = vld [vmem:[%s1238_s0 + $0x50] sm:$0xff]  ;;  %v39_v17 = vld [vmem:[%s1238_s0 + $0x58] sm:$0xff]  ;;  %vm597_vm1 = vcmask 523264  }
  0x10   :  { %v40_v18 = vld [vmem:[%s1238_s0 + $0x60] sm:$0xff]  ;;  %v41_v19 = vld [vmem:[%s1238_s0 + $0x68] sm:$0xff]  ;;  %v65_v20 = vpack.c.bf16 %v39_v17, %v38_v16  ;;  %v42_v22 = vld [vmem:[%s1238_s0 + $0x70] sm:$0xff] }
  0x11   :  { %v66_v21 = vpack.c.bf16 %v41_v19, %v40_v18  ;;  %v43_v23 = vld [vmem:[%s1238_s0 + $0x78] sm:$0xff]  ;;  %v44_v24 = vld [vmem:[%s1238_s0 + $0x80] sm:$0xff]  ;;  %v45_v25 = vld [vmem:[%s1238_s0 + $0x88] sm:$0xff] }
  0x12   :  { %v67_v26 = vpack.c.bf16 %v43_v23, %v42_v22  ;;  %v68_v27 = vpack.c.bf16 %v45_v25, %v44_v24  ;;  %v46_v28 = vld [vmem:[%s1238_s0 + $0x90] sm:$0xff]  ;;  %v47_v29 = vld [vmem:[%s1238_s0 + $0x98] sm:$0xff]  ;;  %v48_v30 = vld [vmem:[%s1238_s0 + $0xa0] sm:$0xff] }
  0x13   :  { %v49_v31 = vld [vmem:[%s1238_s0 + $0xa8] sm:$0xff]  ;;  %v69_v32 = vpack.c.bf16 %v47_v29, %v46_v28  ;;  %v50_v34 = vld [vmem:[%s1238_s0 + $0xb0] sm:$0xff]  ;;  %v51_v35 = vld [vmem:[%s1238_s0 + $0xb8] sm:$0xff] }
  0x14   :  { %v70_v33 = vpack.c.bf16 %v49_v31, %v48_v30  ;;  %v52_v36 = vld [vmem:[%s1238_s0 + $0xc0] sm:$0xff]  ;;  %v53_v37 = vld [vmem:[%s1238_s0 + $0xc8] sm:$0xff]  ;;  %v71_v38 = vpack.c.bf16 %v51_v35, %v50_v34  ;;  %v54_v40 = vld [vmem:[%s1238_s0 + $0xd0] sm:$0xff] }
  0x15   :  { %v72_v39 = vpack.c.bf16 %v53_v37, %v52_v36  ;;  %v55_v41 = vld [vmem:[%s1238_s0 + $0xd8] sm:$0xff]  ;;  %v56_v42 = vld [vmem:[%s1238_s0 + $0xe0] sm:$0xff]  ;;  %v57_v43 = vld [vmem:[%s1238_s0 + $0xe8] sm:$0xff] }
  0x16   :  { %778 = vmatmul.mubr.msk.bf16.gmra.mxu0 %vm91_vm0, %v65_v20  ;;  %v73_v44 = vpack.c.bf16 %v55_v41, %v54_v40  ;;  %v74_v45 = vpack.c.bf16 %v57_v43, %v56_v42  ;;  %v58_v46 = vld [vmem:[%s1238_s0 + $0xf0] sm:$0xff]  ;;  %v59_v47 = vld [vmem:[%s1238_s0 + $0xf8] sm:$0xff]  ;;  %v1128_v1 = vld [vmem:[%s1240_s2] ss:$0 sm:$0xff] }
  0x17   :  { %781 = vmatprep.mubr.msk.bf16.mxu0 %vm91_vm0, %v66_v21  ;;  %v75_v48 = vpack.c.bf16 %v59_v47, %v58_v46 }
  0x1e   :  { %782 = vmatmul.mubr.msk.bf16.gmra.mxu0 %vm91_vm0, %v67_v26 }
  0x1f   :  { %785 = vmatprep.mubr.msk.bf16.mxu0 %vm91_vm0, %v68_v27 }
  0x26   :  { %786 = vmatmul.mubr.msk.bf16.gmra.mxu0 %vm91_vm0, %v69_v32 }
  0x27   :  { %789 = vmatprep.mubr.msk.bf16.mxu0 %vm91_vm0, %v70_v33 }
  0x2e   :  { %790 = vmatmul.mubr.msk.bf16.gmra.mxu0 %vm91_vm0, %v71_v38 }
  0x2f   :  { %793 = vmatprep.mubr.msk.bf16.mxu0 %vm91_vm0, %v72_v39 }
  0x36   :  { %794 = vmatmul.mubr.msk.bf16.gmra.mxu0 %vm91_vm0, %v73_v44 }
  0x37   :  { %797 = vmatprep.mubr.msk.bf16.mxu0 %vm91_vm0, %v74_v45 }
  0x3e   :  { %798 = vmatmul.mubr.msk.bf16.gmra.mxu0 %vm91_vm0, %v75_v48 }
  0xc6   :  { %v771_v49 = vpop.f32.mrf.mxu0 }
  0xc7   :  { %v183_v15 = vadd.f32 %v771_v49, %v1128_v1 }
  0xc8   :  { %v174_v50 = vpop.f32.mrf.mxu0 }
  0xc9   :  { %v175_v3 = vadd.f32 %v1128_v1, %v174_v50  ;;  %v303_v23 = vmax.f32 %v183_v15, 0.0 }
  0xca   :  { %v772_v51 = vpop.f32.mrf.mxu0 }
  0xcb   :  { %v301_v7 = vmax.f32 %v175_v3, 0.0  ;;  %v186_v24 = vadd.f32 %v772_v51, %v1128_v1 }
  0xcc   :  { %v177_v52 = vpop.f32.mrf.mxu0 }
  0xcd   :  { %v178_v8 = vadd.f32 %v1128_v1, %v177_v52  ;;  %v304_v29 = vmax.f32 %v186_v24, 0.0 }
  0xce   :  { %v775_v53 = vpop.f32.mrf.mxu0 }
  0xcf   :  { %v302_v16 = vmax.f32 %v178_v8, 0.0  ;;  %v199_v41 = vadd.f32 %v775_v53, %v1128_v1 }
  0xd0   :  { %v190_v54 = vpop.f32.mrf.mxu0 }
  0xd1   :  { %v191_v30 = vadd.f32 %v1128_v1, %v190_v54  ;;  %v307_v47 = vmax.f32 %v199_v41, 0.0 }
  0xd2   :  { %v776_v55 = vpop.f32.mrf.mxu0 }
  0xd3   :  { %v305_v35 = vmax.f32 %v191_v30, 0.0  ;;  %v202_v48 = vadd.f32 %v776_v55, %v1128_v1 }
  0xd4   :  { %v193_v56 = vpop.f32.mrf.mxu0 }
  0xd5   :  { %v194_v36 = vadd.f32 %v1128_v1, %v193_v56  ;;  %v308_v54 = vmax.f32 %v202_v48, 0.0 }
  0xd6   :  { %v1109_v57 = vpop.f32.mrf.mxu0 }
  0xd7   :  { %v306_v42 = vmax.f32 %v194_v36, 0.0 }
  0xd8   :  { %v1111_v58 = vpop.f32.mrf.mxu0 }
  0xd9   :  { %v207_v53 = vadd.f32 %v1128_v1, %v1111_v58 }
  0xda   :  { %v1113_v59 = vpop.f32.mrf.mxu0 }
  0xdc   :  { %v1115_v60 = vpop.f32.mrf.mxu0 }
  0xdd   :  { %v210_v55 = vadd.f32 %v1128_v1, %v1115_v60  ;;  %v218_v60 = vadd.f32 %v1113_v59, %v1128_v1 }
  0xde   :  { %v1117_v61 = vpop.f32.mrf.mxu0 }
  0xdf   :  { %v310_v58 = vmax.f32 %v210_v55, 0.0 }
  0xe0   :  { %v1119_v62 = vpop.f32.mrf.mxu0 }
  0xe2   :  { %v1121_v63 = vpop.f32.mrf.mxu0 }
  0xe4   :  { %v1123_v0 = vpop.f32.mrf.mxu0 }
  0xe6   :  { %v787_v2 = vpop.f32.mrf.mxu0 }
  0xe7   :  { %v247_v11 = vadd.f32 %v787_v2, %v1128_v1 }
  0xe8   :  { %v238_v4 = vpop.f32.mrf.mxu0 }
  0xe9   :  { %v239_v5 = vadd.f32 %v1128_v1, %v238_v4  ;;  %v319_v19 = vmax.f32 %v247_v11, 0.0 }
  0xea   :  { %v788_v6 = vpop.f32.mrf.mxu0 }
  0xeb   :  { %v317_v9 = vmax.f32 %v239_v5, 0.0  ;;  %v250_v20 = vadd.f32 %v788_v6, %v1128_v1  ;;  %v807_v27 = vpack.i.bf16 %v303_v23, %v319_v19  ;;  %v309_v5 = vmax.f32 %v207_v53, 0.0 }
  0xec   :  { %v241_v10 = vpop.f32.mrf.mxu0 }
  0xed   :  { %v242_v12 = vadd.f32 %v1128_v1, %v241_v10  ;;  %v803_v13 = vpack.i.bf16 %v301_v7, %v317_v9  ;;  %v320_v25 = vmax.f32 %v250_v20, 0.0  ;;  %v215_v10 = vadd.f32 %v1109_v57, %v1128_v1 }
  0xee   :  { %v791_v14 = vpop.f32.mrf.mxu0  ;;  %v312_v20 = vmax.f32 %v218_v60, 0.0  ;;  %v223_v57 = vadd.f32 %v1128_v1, %v1119_v62 }
  0xef   :  { %v318_v17 = vmax.f32 %v242_v12, 0.0  ;;  %804 = vxpose.xlu0.b32.start [1/16] %v803_v13, 128  ;;  %v809_v33 = vpack.i.bf16 %v304_v29, %v320_v25  ;;  %v263_v37 = vadd.f32 %v791_v14, %v1128_v1  ;;  %v311_v15 = vmax.f32 %v215_v10, 0.0 }
  0xf0   :  { %v254_v18 = vpop.f32.mrf.mxu0  ;;  %v313_v24 = vmax.f32 %v223_v57, 0.0  ;;  %v226_v25 = vadd.f32 %v1128_v1, %v1123_v0 }
  0xf1   :  { %v805_v21 = vpack.i.bf16 %v302_v16, %v318_v17  ;;  %v255_v26 = vadd.f32 %v1128_v1, %v254_v18  ;;  %v323_v43 = vmax.f32 %v263_v37, 0.0  ;;  %v952_v37 = vmov 0  }
  0xf2   :  { %v792_v22 = vpop.f32.mrf.mxu0  ;;  %v314_v29 = vmax.f32 %v226_v25, 0.0  ;;  %525 = vmatprep.mubr.bf16.mxu1 %v952_v37  ;;  %915 = vset.pattern.permute.xlu1 %v952_v37 }
  0xf3   :  { %806 = vxpose.xlu0.b32.cont [2/16] %v805_v21, 128  ;;  %v321_v31 = vmax.f32 %v255_v26, 0.0  ;;  %v266_v44 = vadd.f32 %v792_v22, %v1128_v1  ;;  %v815_v51 = vpack.i.bf16 %v307_v47, %v323_v43  ;;  %v423_v47 = vld [vmem:[%s1242_s4 + $0x10] sm:$0xff] }
  0xf4   :  { %v257_v28 = vpop.f32.mrf.mxu0 }
  0xf5   :  { %v258_v32 = vadd.f32 %v1128_v1, %v257_v28  ;;  %v811_v39 = vpack.i.bf16 %v305_v35, %v321_v31  ;;  %v324_v49 = vmax.f32 %v266_v44, 0.0  ;;  %v231_v28 = vadd.f32 %v1117_v61, %v1128_v1  ;;  %v427_v61 = vld [vmem:[%s1242_s4 + $0x30] sm:$0xff] }
  0xf6   :  { %v795_v34 = vpop.f32.mrf.mxu0  ;;  %461 = vperm.xlu1 %915, %v427_v61  }
  0xf7   :  { %808 = vxpose.xlu0.b32.cont [3/16] %v807_v27, 128  ;;  %v322_v38 = vmax.f32 %v258_v32, 0.0  ;;  %v817_v3 = vpack.i.bf16 %v308_v54, %v324_v49  ;;  %v279_v6 = vadd.f32 %v795_v34, %v1128_v1  ;;  %v315_v32 = vmax.f32 %v231_v28, 0.0  ;;  %v424_v49 = vld [vmem:[%s1242_s4 + $0x18] sm:$0xff] }
  0xf8   :  { %v270_v40 = vpop.f32.mrf.mxu0 }
  0xf9   :  { %v813_v45 = vpack.i.bf16 %v306_v42, %v322_v38  ;;  %v271_v50 = vadd.f32 %v1128_v1, %v270_v40  ;;  %v327_v11 = vmax.f32 %v279_v6, 0.0  ;;  %v591_v6 = vld [vmem:[%s1244_s6] sm:$0xf] }
  0xfa   :  { %v796_v46 = vpop.f32.mrf.mxu0 }
  0xfb   :  { %810 = vxpose.xlu0.b32.cont [4/16] %v809_v33, 128  ;;  %v325_v56 = vmax.f32 %v271_v50, 0.0  ;;  %v282_v12 = vadd.f32 %v796_v46, %v1128_v1  ;;  %v823_v18 = vpack.i.bf16 %v311_v15, %v327_v11  ;;  %v234_v33 = vadd.f32 %v1121_v63, %v1128_v1  ;;  %v428_v63 = vld [vmem:[%s1242_s4 + $0x38] sm:$0xff] }
  0xfc   :  { %v273_v52 = vpop.f32.mrf.mxu0  ;;  %466 = vperm.xlu1 %915, %v428_v63  }
  0xfd   :  { %v274_v2 = vadd.f32 %v1128_v1, %v273_v52  ;;  %v819_v8 = vpack.i.bf16 %v309_v5, %v325_v56  ;;  %v328_v16 = vmax.f32 %v282_v12, 0.0  ;;  %v316_v35 = vmax.f32 %v234_v33, 0.0  ;;  %v422_v5 = vld [vmem:[%s1242_s4 + $0x8] sm:$0xff] }
  0xfe   :  { %v799_v4 = vpop.f32.mrf.mxu0 }
  0xff   :  { %812 = vxpose.xlu0.b32.cont [5/16] %v811_v39, 128  ;;  %v326_v7 = vmax.f32 %v274_v2, 0.0  ;;  %v825_v23 = vpack.i.bf16 %v312_v20, %v328_v16  ;;  %v295_v59 = vadd.f32 %v799_v4, %v1128_v1  ;;  %v426_v39 = vld [vmem:[%s1242_s4 + $0x28] sm:$0xff] }
 0x100   :  { %v286_v9 = vpop.f32.mrf.mxu0 }
 0x101   :  { %v821_v13 = vpack.i.bf16 %v310_v58, %v326_v7  ;;  %v287_v17 = vadd.f32 %v1128_v1, %v286_v9  ;;  %v331_v62 = vmax.f32 %v295_v59, 0.0 }
 0x102   :  { %v800_v14 = vpop.f32.mrf.mxu0 }
 0x103   :  { %814 = vxpose.xlu0.b32.cont [6/16] %v813_v45, 128  ;;  %v329_v21 = vmax.f32 %v287_v17, 0.0  ;;  %v298_v30 = vadd.f32 %v800_v14, %v1128_v1  ;;  %v831_v34 = vpack.i.bf16 %v315_v32, %v331_v62 }
 0x104   :  { %v289_v19 = vpop.f32.mrf.mxu0 }
 0x105   :  { %v290_v22 = vadd.f32 %v1128_v1, %v289_v19  ;;  %v827_v27 = vpack.i.bf16 %v313_v24, %v329_v21  ;;  %v332_v0 = vmax.f32 %v298_v30, 0.0  ;;  %v425_v1 = vld [vmem:[%s1242_s4 + $0x20] sm:$0xff] }
 0x106   :  { %451 = vperm.xlu1 %915, %v425_v1  }
 0x107   :  { %816 = vxpose.xlu0.b32.cont [7/16] %v815_v51, 128  ;;  %v330_v26 = vmax.f32 %v290_v22, 0.0  ;;  %v833_v36 = vpack.i.bf16 %v316_v35, %v332_v0 }
 0x109   :  { %v829_v31 = vpack.i.bf16 %v314_v29, %v330_v26 }
 0x10a   :  { %456 = vperm.xlu1 %915, %v426_v39  }
 0x10b   :  { %818 = vxpose.xlu0.b32.cont [8/16] %v817_v3, 128  ;;  %v421_v3 = vld [vmem:[%s1242_s4] sm:$0xff] }
 0x10e   :  { %441 = vperm.xlu1 %915, %v423_v47   ;;  %v918_v47 = vld [vmem:[%s1241_s3] sm:$0xff]  }
 0x10f   :  { %820 = vxpose.xlu0.b32.cont [9/16] %v819_v8, 128 }
 0x112   :  { %446 = vperm.xlu1 %915, %v424_v49  }
 0x113   :  { %822 = vxpose.xlu0.b32.cont [10/16] %v821_v13, 128 }
 0x116   :  { %431 = vperm.xlu1 %915, %v421_v3  }
 0x117   :  { %824 = vxpose.xlu0.b32.cont [11/16] %v823_v18, 128 }
 0x11a   :  { %436 = vperm.xlu1 %915, %v422_v5  }
 0x11b   :  { %826 = vxpose.xlu0.b32.cont [12/16] %v825_v23, 128 }
 0x11e   :  { %594 = vperm.xlu1 %915, %v591_v6  }
 0x11f   :  { %828 = vxpose.xlu0.b32.cont [13/16] %v827_v27, 128 }
 0x123   :  { %830 = vxpose.xlu0.b32.cont [14/16] %v829_v31, 128 }
 0x127   :  { %832 = vxpose.xlu0.b32.cont [15/16] %v831_v34, 128 }
 0x12b   :  { %834 = vxpose.xlu0.b32.end [16/16] %v833_v36, 128 }
 0x154   :  { %916 = vset.pattern.permute.xlu0 %v952_v37 }
 0x16b   :  { %v835_v38 = vpop.trf.xlu0 }
 0x16c   :  { %v839_v40 = vunpack.i.h.bf16 %v835_v38  ;;  %v836_v41 = vunpack.i.l.bf16 %v835_v38 }
 0x16f   :  { %v840_v42 = vpop.trf.xlu0 }
 0x170   :  { %v844_v43 = vunpack.i.h.bf16 %v840_v42  ;;  %v841_v44 = vunpack.i.l.bf16 %v840_v42 }
 0x171   :  { %v462_v49 = vpop.permute.xlu1 %461 }
 0x172   :  { %v1185_v45 = vpack.c.bf16 %v841_v44, %v836_v41  ;;  %v1187_v46 = vpack.c.bf16 %v844_v43, %v839_v40 }
 0x173   :  { %v845_v48 = vpop.trf.xlu0 }
 0x174   :  { %v849_v50 = vunpack.i.h.bf16 %v845_v48  ;;  %v846_v51 = vunpack.i.l.bf16 %v845_v48  ;;  %v919_v48 = vld [vmem:[%s1241_s3 + $0x8] sm:$0xff]  }
 0x177   :  { %v850_v52 = vpop.trf.xlu0 }
 0x178   :  { %v854_v54 = vunpack.i.h.bf16 %v850_v52  ;;  %v851_v53 = vunpack.i.l.bf16 %v850_v52 }
 0x17a   :  { %v1195_v56 = vpack.c.bf16 %v851_v53, %v846_v51  ;;  %v1197_v2 = vpack.c.bf16 %v854_v54, %v849_v50  ;;  %v467_v50 = vpop.permute.xlu1 %466 }
 0x17b   :  { %v1202_v4 = vpop.trf.xlu0 }
 0x17c   :  { %v856_v39 = vunpack.i.l.bf16 %v1202_v4  ;;  %v859_v43 = vunpack.i.h.bf16 %v1202_v4 }
 0x17f   :  { %v860_v55 = vpop.trf.xlu0 }
 0x180   :  { %v861_v63 = vunpack.i.l.bf16 %v860_v55  ;;  %v864_v40 = vunpack.i.h.bf16 %v860_v55 }
 0x181   :  { %v452_v53 = vpop.permute.xlu1 %451 }
 0x182   :  { %v402_v42 = vpack.c.bf16 %v861_v63, %v856_v39  ;;  %v401_v44 = vpack.c.bf16 %v864_v40, %v859_v43 }
 0x183   :  { %v865_v7 = vpop.trf.xlu0 }
 0x184   :  { %v866_v35 = vunpack.i.l.bf16 %v865_v7  ;;  %v869_v38 = vunpack.i.h.bf16 %v865_v7 }
 0x185   :  { %v457_v4 = vpop.permute.xlu1 %456 }
 0x187   :  { %v870_v8 = vpop.trf.xlu0 }
 0x188   :  { %v871_v33 = vunpack.i.l.bf16 %v870_v8  ;;  %v874_v36 = vunpack.i.h.bf16 %v870_v8 }
 0x189   :  { %v442_v7 = vpop.permute.xlu1 %441 }
 0x18a   :  { %v404_v1 = vpack.c.bf16 %v871_v33, %v866_v35  ;;  %v403_v41 = vpack.c.bf16 %v874_v36, %v869_v38 }
 0x18b   :  { %v875_v9 = vpop.trf.xlu0 }
 0x18c   :  { %v876_v30 = vunpack.i.l.bf16 %v875_v9  ;;  %v879_v34 = vunpack.i.h.bf16 %v875_v9 }
 0x18f   :  { %v880_v10 = vpop.trf.xlu0 }
 0x190   :  { %v881_v28 = vunpack.i.l.bf16 %v880_v10  ;;  %v884_v31 = vunpack.i.h.bf16 %v880_v10 }
 0x192   :  { %v406_v0 = vpack.c.bf16 %v881_v28, %v876_v30  ;;  %v405_v61 = vpack.c.bf16 %v884_v31, %v879_v34 }
 0x193   :  { %v885_v58 = vpop.trf.xlu0 }
 0x194   :  { %v886_v59 = vunpack.i.l.bf16 %v885_v58  ;;  %v889_v62 = vunpack.i.h.bf16 %v885_v58  ;;  %v447_v58 = vpop.permute.xlu1 %446 }
 0x197   :  { %v890_v11 = vpop.trf.xlu0 }
 0x198   :  { %v891_v23 = vunpack.i.l.bf16 %v890_v11  ;;  %v894_v26 = vunpack.i.h.bf16 %v890_v11 }
 0x19a   :  { %v408_v29 = vpack.c.bf16 %v891_v23, %v886_v59  ;;  %v407_v32 = vpack.c.bf16 %v894_v26, %v889_v62 }
 0x19b   :  { %v895_v12 = vpop.trf.xlu0 }
 0x19c   :  { %v896_v20 = vunpack.i.l.bf16 %v895_v12  ;;  %v899_v25 = vunpack.i.h.bf16 %v895_v12 }
 0x19f   :  { %v900_v13 = vpop.trf.xlu0 }
 0x1a0   :  { %v901_v15 = vunpack.i.l.bf16 %v900_v13  ;;  %v904_v22 = vunpack.i.h.bf16 %v900_v13 }
 0x1a2   :  { %v410_v24 = vpack.c.bf16 %v901_v15, %v896_v20  ;;  %v409_v27 = vpack.c.bf16 %v904_v22, %v899_v25 }
 0x1a3   :  { %v905_v14 = vpop.trf.xlu0 }
 0x1a4   :  { %v906_v16 = vunpack.i.l.bf16 %v905_v14  ;;  %v909_v17 = vunpack.i.h.bf16 %v905_v14 }
 0x1a7   :  { %v910_v60 = vpop.trf.xlu0 }
 0x1a8   :  { %v911_v18 = vunpack.i.l.bf16 %v910_v60  ;;  %v914_v19 = vunpack.i.h.bf16 %v910_v60  ;;  %v432_v60 = vpop.permute.xlu1 %431 }
 0x1aa   :  { %v412_v57 = vpack.c.bf16 %v911_v18, %v906_v16  ;;  %v411_v21 = vpack.c.bf16 %v914_v19, %v909_v17 }
 0x1ac   :  { %493 = vmatprep.subr.bf16.mxu1 %v412_v57 }
 0x1ad   :  { %494 = vmatpush1.bf16.msra.mxu1 %v411_v21 }
 0x1ae   :  { %495 = vmatprep.subr.bf16.mxu1 %v410_v24 }
 0x1b1   :  { %496 = vmatpush1.bf16.msra.mxu1 %v409_v27 }
 0x1b2   :  { %497 = vmatprep.subr.bf16.mxu1 %v408_v29  ;;  %v437_v29 = vpop.permute.xlu1 %436 }
 0x1b5   :  { %498 = vmatpush1.bf16.msra.mxu1 %v407_v32 }
 0x1b6   :  { %499 = vmatprep.subr.bf16.mxu1 %v406_v0 }
 0x1b9   :  { %500 = vmatpush1.bf16.msra.mxu1 %v405_v61 }
 0x1ba   :  { %501 = vmatprep.subr.bf16.mxu1 %v404_v1 }
 0x1bd   :  { %502 = vmatpush1.bf16.msra.mxu1 %v403_v41 }
 0x1be   :  { %503 = vmatprep.subr.bf16.mxu1 %v402_v42 }
 0x1c1   :  { %504 = vmatpush1.bf16.msra.mxu1 %v401_v44 }
 0x1c2   :  { %505 = vmatprep.subr.bf16.mxu1 %v1195_v56 }
 0x1c5   :  { %506 = vmatpush1.bf16.msra.mxu1 %v1197_v2 }
 0x1c6   :  { %507 = vmatprep.subr.bf16.mxu1 %v1185_v45  ;;  %v920_v45 = vld [vmem:[%s1241_s3 + $0x10] sm:$0xff]  }
 0x1c9   :  { %508 = vmatpush1.bf16.msra.mxu1 %v1187_v46  ;;  %v921_v46 = vld [vmem:[%s1241_s3 + $0x18] sm:$0xff]  }
 0x1cc   :  { %526 = vmatmul.mubr.bf16.vlgmr.msra.gmra.mxu1 %v918_v47 }
 0x1cd   :  { %535 = vmatprep.mubr.bf16.mxu1 %v952_v37 }
 0x1d4   :  { %536 = vmatmul.mubr.bf16.gmra.mxu1 %v919_v48 }
 0x1d5   :  { %545 = vmatprep.mubr.bf16.mxu1 %v952_v37 }
 0x1dc   :  { %546 = vmatmul.mubr.bf16.gmra.mxu1 %v920_v45 }
 0x1dd   :  { %555 = vmatprep.mubr.bf16.mxu1 %v952_v37 }
 0x1e4   :  { %556 = vmatmul.mubr.bf16.gmra.mxu1 %v921_v46 }
 0x1e5   :  { %633 = vmatprep.mubr.bf16.mxu1 %v952_v37 }
 0x28c   :  { %v527_v51 = vpop.f32.mrf.mxu1 }
 0x28d   :  { %v528_v41 = vadd.f32 %v527_v51, %v432_v60  ;;  %v595_v51 = vpop.permute.xlu1 %594 }
 0x28e   :  { %v529_v52 = vpop.f32.mrf.mxu1 }
 0x28f   :  { %v530_v36 = vadd.f32 %v529_v52, %v432_v60  ;;  %v566_v45 = vmax.f32 %v528_v41, 0.0 }
 0x290   :  { %v531_v54 = vpop.f32.mrf.mxu1 }
 0x291   :  { %v532_v63 = vadd.f32 %v531_v54, %v437_v29  ;;  %v567_v43 = vmax.f32 %v530_v36, 0.0 }
 0x292   :  { %v533_v56 = vpop.f32.mrf.mxu1 }
 0x293   :  { %v534_v32 = vadd.f32 %v533_v56, %v437_v29  ;;  %v568_v44 = vmax.f32 %v532_v63, 0.0 }
 0x294   :  { %v537_v2 = vpop.f32.mrf.mxu1 }
 0x295   :  { %v538_v34 = vadd.f32 %v537_v2, %v442_v7  ;;  %v569_v39 = vmax.f32 %v534_v32, 0.0  ;;  %v583_v46 = vpack.c.bf16 %v568_v44, %v566_v45 }
 0x296   :  { %v539_v3 = vpop.f32.mrf.mxu1 }
 0x297   :  { %v540_v26 = vadd.f32 %v539_v3, %v442_v7  ;;  %v570_v42 = vmax.f32 %v538_v34, 0.0  ;;  %v584_v48 = vpack.c.bf16 %v569_v39, %v567_v43 }
 0x298   :  { %v541_v5 = vpop.f32.mrf.mxu1 }
 0x299   :  { %v542_v62 = vadd.f32 %v541_v5, %v447_v58  ;;  %v571_v61 = vmax.f32 %v540_v26, 0.0 }
 0x29a   :  { %v543_v55 = vpop.f32.mrf.mxu1 }
 0x29b   :  { %v544_v21 = vadd.f32 %v543_v55, %v447_v58  ;;  %v572_v1 = vmax.f32 %v542_v62, 0.0 }
 0x29c   :  { %v547_v6 = vpop.f32.mrf.mxu1 }
 0x29d   :  { %v548_v25 = vadd.f32 %v547_v6, %v452_v53  ;;  %v573_v33 = vmax.f32 %v544_v21, 0.0  ;;  %v585_v47 = vpack.c.bf16 %v572_v1, %v570_v42 }
 0x29e   :  { %v549_v8 = vpop.f32.mrf.mxu1 }
 0x29f   :  { %v550_v18 = vadd.f32 %v549_v8, %v452_v53  ;;  %v574_v35 = vmax.f32 %v548_v25, 0.0  ;;  %v586_v40 = vpack.c.bf16 %v573_v33, %v571_v61 }
 0x2a0   :  { %v551_v9 = vpop.f32.mrf.mxu1 }
 0x2a1   :  { %v552_v20 = vadd.f32 %v551_v9, %v457_v4  ;;  %v575_v27 = vmax.f32 %v550_v18, 0.0 }
 0x2a2   :  { %v553_v10 = vpop.f32.mrf.mxu1 }
 0x2a3   :  { %v554_v13 = vadd.f32 %v553_v10, %v457_v4  ;;  %v576_v30 = vmax.f32 %v552_v20, 0.0 }
 0x2a4   :  { %v557_v11 = vpop.f32.mrf.mxu1 }
 0x2a5   :  { %v558_v16 = vadd.f32 %v557_v11, %v462_v49  ;;  %v577_v22 = vmax.f32 %v554_v13, 0.0  ;;  %v587_v38 = vpack.c.bf16 %v576_v30, %v574_v35 }
 0x2a6   :  { %v559_v37 = vpop.f32.mrf.mxu1 }
 0x2a7   :  { %v560_v14 = vadd.f32 %v559_v37, %v462_v49  ;;  %v578_v59 = vmax.f32 %v558_v16, 0.0  ;;  %v588_v0 = vpack.c.bf16 %v577_v22, %v575_v27  ;;  %v582_v49 = vld [vmem:[%s1243_s5] sm:$0x3]  ;;  %s953_s5 = smov [#allocation2]  }
 0x2a8   :  { %v561_v12 = vpop.f32.mrf.mxu1  ;;  %s719_s18 = sshll.u32 %s953_s5, 4  ;;  %s720_s18 = int_to_ptr.vmem [resolvable:$true] %s719_s18 }
 0x2a9   :  { %v562_v15 = vadd.f32 %v561_v12, %v467_v50  ;;  %v579_v23 = vmax.f32 %v560_v14, 0.0  ;;  %s930_s2 = scalar_lea.vmem %s720_s18, 128  ;;  %p935_p1 = scmp.lt.s32.totalorder %s720_s18, %s720_s18 }
 0x2aa   :  { %v563_v17 = vpop.f32.mrf.mxu1  ;;  %p931_p0 = scmp.ne.s32.totalorder %s720_s18, %s930_s2  ;;  %p936_p2 = scmp.lt.s32.totalorder %s930_s2, %s930_s2 }
 0x2ab   :  { %v564_v19 = vadd.f32 %v563_v17, %v467_v50  ;;  %v580_v57 = vmax.f32 %v562_v15, 0.0  ;;  %v662_v50 = vlaneseq }
 0x2ac   :  { %p937_p3 = por %p936_p2, %p935_p1 }
 0x2ad   :  { %v581_v24 = vmax.f32 %v564_v19, 0.0  ;;  %v589_v31 = vpack.c.bf16 %v580_v57, %v578_v59  ;;  %v663_v53 = vshrl.u32 %v662_v50, 7 }
 0x2ae   :  { %p938_p4 = pnand %p937_p3, %p931_p0 }
 0x2af   :  { %v590_v28 = vpack.c.bf16 %v581_v24, %v579_v23  ;;  %v664_v7 = vsub.s32 0, %v663_v53 }
 0x2b1   :  { %609 = vmatprep.subr.bf16.mxu1 %v590_v28 }
 0x2b2   :  { %610 = vmatpush1.bf16.msra.mxu1 %v589_v31 }
 0x2b3   :  { %611 = vmatprep.subr.bf16.mxu1 %v588_v0 }
 0x2b6   :  { %612 = vmatpush1.bf16.msra.mxu1 %v587_v38 }
 0x2b7   :  { %613 = vmatprep.subr.bf16.mxu1 %v586_v40 }
 0x2ba   :  { %614 = vmatpush1.bf16.msra.mxu1 %v585_v47 }
 0x2bb   :  { %615 = vmatprep.subr.bf16.mxu1 %v584_v48 }
 0x2be   :  { %616 = vmatpush1.bf16.msra.mxu1 %v583_v46 }
 0x2c1   :  { %749 = vmatmul.mubr.msk.bf16.vlgmr.msra.gmra.mxu1 %vm597_vm1, %v582_v49 }
 0x381   :  { %v635_v52 = vpop.f32.mrf.mxu1 }
 0x382   :  { %v636_v54 = vadd.f32 %v635_v52, %v595_v51 }
 0x383   :  { %v637_v56 = vpop.f32.mrf.mxu1 }
 0x384   :  { %v644_v2 = vrot.slane %v636_v54, 1  ;;  %v638_v3 = vadd.f32 %v637_v56, %v595_v51  ;;  %v650_v55 = vrot.slane %v636_v54, 2  ;;  %v656_v10 = vrot.slane %v636_v54, 3 }
 0x385   :  { %v639_v4 = vpop.f32.mrf.mxu1 }
 0x386   :  { %v648_v5 = vmax.f32 %v636_v54, %v644_v2  ;;  %v645_v6 = vrot.slane %v638_v3, 1  ;;  %v651_v11 = vrot.slane %v638_v3, 2  ;;  %v657_v13 = vrot.slane %v638_v3, 3 }
 0x387   :  { %v640_v8 = vpop.f32.mrf.mxu1 }
 0x388   :  { %v654_v9 = vmax.f32 %v648_v5, %v650_v55  ;;  %v649_v58 = vmax.f32 %v638_v3, %v645_v6 }
 0x38a   :  { %v660_v37 = vmax.f32 %v654_v9, %v656_v10  ;;  %v655_v12 = vmax.f32 %v649_v58, %v651_v11 }
 0x38c   :  { %v665_v14 = vrot.slane %v660_v37, %v664_v7  ;;  %v661_v15 = vmax.f32 %v655_v12, %v657_v13 }
 0x38e   :  { %v670_v60 = vsub.f32 %v636_v54, %v665_v14  ;;  %v669_v16 = vrot.slane %v661_v15, %v664_v7 }
 0x390   :  { %v672_v17 = vmul.f32 1.442695, %v670_v60  ;;  %v671_v18 = vsub.f32 %v638_v3, %v669_v16 }
 0x392   :  { %922 = vpow2.f32 %v672_v17  ;;  %v674_v19 = vmul.f32 1.442695, %v671_v18 }
 0x394   :  { %924 = vpow2.f32 %v674_v19 }
 0x39f   :  { %v923_v20 = vpop.eup %922 }
 0x3a0   :  { %v678_v57 = vrot.slane %v923_v20, 1  ;;  %v684_v24 = vrot.slane %v923_v20, 2  ;;  %v690_v27 = vrot.slane %v923_v20, 3 }
 0x3a1   :  { %v925_v21 = vpop.eup %924 }
 0x3a2   :  { %v679_v22 = vrot.slane %v925_v21, 1  ;;  %v682_v23 = vadd.f32 %v923_v20, %v678_v57  ;;  %v685_v59 = vrot.slane %v925_v21, 2  ;;  %v691_v29 = vrot.slane %v925_v21, 3 }
 0x3a4   :  { %v683_v25 = vadd.f32 %v925_v21, %v679_v22  ;;  %v688_v26 = vadd.f32 %v684_v24, %v682_v23 }
 0x3a6   :  { %v689_v28 = vadd.f32 %v685_v59, %v683_v25  ;;  %v694_v62 = vadd.f32 %v690_v27, %v688_v26 }
 0x3a8   :  { %v695_v30 = vadd.f32 %v691_v29, %v689_v28  ;;  %926 = vrcp.f32 %v694_v62 }
 0x3aa   :  { %928 = vrcp.f32 %v695_v30 }
 0x3b5   :  { %v927_v31 = vpop.eup %926 }
 0x3b6   :  { %v701_v32 = vrot.slane %v927_v31, %v664_v7 }
 0x3b7   :  { %v929_v33 = vpop.eup %928 }
 0x3b8   :  { %v705_v0 = vrot.slane %v929_v33, %v664_v7  ;;  %v706_v34 = vmul.f32 %v923_v20, %v701_v32 }
 0x3ba   :  { %v707_v35 = vmul.f32 %v925_v21, %v705_v0 }
 0x3bc   :  { %v710_v36 = vcombine.low %v706_v34, %v707_v35 }
 0x3be   :  { %712 = vst [vmem:[#allocation2] sm:$0xff] %v710_v36 }
 0x3bf   :  { %941 = shalt.err (!%p938_p4)
}
 0x3c0   :  { %722 = dma.vmem_to_hbm [thread:$0]  %s720_s18, 128, %s1245_s7, [#allocation3]  }
 0x3c1   :  { %950 = dma.done.wait [#allocation3], 128  }
 0x3c2   :  { %951 = vsyncadd [#allocation3], 4294967168 }
 0x3c3   :  { %726 = vsyncpa [#allocation3], 1 }

</bundles_post_ra>
